<compile_context>
chip_gen: v5e
topology: v5e:2x2
jax: 0.10.0
libtpu: 0.0.40
codegen_flags: <defaults>
</compile_context>

<pallas_src>
import jax
import jax.numpy as jnp
from jax.experimental import pallas as pl
from jax.experimental.pallas import tpu as pltpu


def _scaling_kernel(a_ref, b_ref, x_ref, o_ref):
    # a_ref / b_ref: (rb, 1) f32 per-row parameter tiles (a = 1/scale,
    # b = -shift/scale), broadcast over the lane (column) axis by the VPU.
    # Compute in f32, single cast on store.
    x = x_ref[...].astype(jnp.float32)
    o_ref[...] = (x * a_ref[...] + b_ref[...]).astype(o_ref.dtype)


def _round_up(x: int, m: int) -> int:
    return (x + m - 1) // m * m


def _sublane_align(dtype) -> int:
    """Packed sublane tile height: 8 rows for 32-bit, 16 for 16-bit, 32 for 8-bit."""
    bits = jnp.dtype(dtype).itemsize * 8
    return max(8, 256 // bits)


def scaling_layer(
    x: jax.Array,
    shift: jax.Array,
    scale: jax.Array,
    *,
    col_target: int = 4096,          # lane block cap (multiple of 128)
    block_bytes: int = 8 << 20,      # per-buffer cap: ~16 MiB (in+out) per grid step
    vmem_limit_bytes: int = 48 << 20,
) -> jax.Array:
    """Compute (x - shift[c]) / scale[c] per channel. x: (N, C, H, W)."""
    N, C, H, W = x.shape
    R, S = N * C, H * W
    itemsize = jnp.dtype(x.dtype).itemsize
    align = _sublane_align(x.dtype)

    # Lane-dense 2-D view: rows enumerate (n, c), columns the contiguous plane.
    x2 = x.reshape(R, S)

    # Fold (x - shift) / scale into x * a + b; keep the tiny tables in f32.
    a = (1.0 / scale).astype(jnp.float32)
    b = (-shift / scale).astype(jnp.float32)
    a_rows = jnp.tile(a, N).reshape(R, 1)   # row r -> channel r % C
    b_rows = jnp.tile(b, N).reshape(R, 1)

    # ---- block picking ----------------------------------------------------
    # Column (lane) block: full extent if it fits in one block, otherwise a
    # multiple of 128 (unmasked vst on interior blocks; pl.cdiv grid masks the
    # tail block only).
    cb = S if S <= col_target else col_target

    # Row (sublane) block: largest multiple of the packed-tile height such that
    # a single x/out buffer stays under block_bytes (bounds rb*cb jointly, so
    # awkward H*W can never blow past scoped VMEM).
    rb = max(align, (block_bytes // max(cb * itemsize, 1)) // align * align)
    rb = min(rb, _round_up(R, align))
    if rb >= R:
        rb = R  # full-extent row block is always legal, avoids a padded tail

    steps_r, steps_c = pl.cdiv(R, rb), pl.cdiv(S, cb)
    # v7x megacore: best effort to keep the parallel step count even so one of
    # the two TensorCores is not left idle for a whole (large) block.
    if steps_r * steps_c > 1 and (steps_r % 2 == 1) and (steps_c % 2 == 1):
        rb_try = max(align, _round_up(max(rb // 2, 1), align))
        if rb_try < rb and pl.cdiv(R, rb_try) % 2 == 0:
            rb = rb_try
            steps_r = pl.cdiv(R, rb)

    grid = (steps_r, steps_c)

    out2 = pl.pallas_call(
        _scaling_kernel,
        out_shape=jax.ShapeDtypeStruct((R, S), x.dtype),
        grid=grid,
        in_specs=[
            pl.BlockSpec((rb, 1), lambda i, j: (i, 0)),   # a = 1/scale rows
            pl.BlockSpec((rb, 1), lambda i, j: (i, 0)),   # b = -shift/scale rows
            pl.BlockSpec((rb, cb), lambda i, j: (i, j)),  # x slab
        ],
        out_specs=pl.BlockSpec((rb, cb), lambda i, j: (i, j)),
        compiler_params=pltpu.CompilerParams(
            dimension_semantics=("parallel", "parallel"),
            vmem_limit_bytes=vmem_limit_bytes,
        ),
    )(a_rows, b_rows, x2)

    return out2.reshape(N, C, H, W)


def scaling_layer_ref(x, shift, scale):
    # Pure-JAX reference mirroring the PyTorch broadcast [None, :, None, None].
    return (x - shift[None, :, None, None]) / scale[None, :, None, None]


if __name__ == "__main__":
    # Deterministic buffers exactly as registered in ScalingLayer.__init__.
    shift = jnp.array([-0.03, -0.088, -0.188], dtype=jnp.float32)
    scale = jnp.array([0.458, 0.448, 0.45], dtype=jnp.float32)

    # Small NCHW input (3 channels required by the buffers).
    key = jax.random.PRNGKey(0)
    x = jax.random.normal(key, (2, 3, 16, 16), dtype=jnp.float32)

    out = scaling_layer(x, shift, scale)
    out = jax.block_until_ready(out)

    ref = scaling_layer_ref(x, shift, scale)
    assert out.shape == ref.shape and out.dtype == ref.dtype
    # x*(1/scale) + (-shift/scale) differs from a true divide by a few ulps;
    # keep a tolerance-based check.
    assert jnp.allclose(out, ref, atol=1e-6, rtol=1e-5)

    print("KERNEL_OK")
</pallas_src>

<mosaic_0001>
module attributes {stable_mosaic.version = 11 : i64} {
  func.func @_scaling_kernel(%arg0: i32, %arg1: i32, %arg2: memref<6x1xf32, #tpu.memory_space<vmem>>, %arg3: memref<6x1xf32, #tpu.memory_space<vmem>>, %arg4: memref<6x256xf32, #tpu.memory_space<vmem>>, %arg5: memref<6x256xf32, #tpu.memory_space<vmem>>) attributes {dimension_semantics = [#tpu.dimension_semantics<parallel>, #tpu.dimension_semantics<parallel>], iteration_bounds = array<i64: 1, 1>, scalar_prefetch = 0 : i64, scratch_operands = 0 : i64, tpu.core_type = #tpu.core_type<tc>, window_params = [{transform_indices = @transform_0, window_bounds = array<i64: 6, 1>}, {transform_indices = @transform_1, window_bounds = array<i64: 6, 1>}, {transform_indices = @transform_2, window_bounds = array<i64: 6, 256>}, {transform_indices = @transform_3, window_bounds = array<i64: 6, 256>}]} {
    %c0 = arith.constant 0 : index
    %c0_0 = arith.constant 0 : index
    %0 = vector.load %arg4[%c0, %c0_0] : memref<6x256xf32, #tpu.memory_space<vmem>>, vector<6x256xf32>
    %c0_1 = arith.constant 0 : index
    %c0_2 = arith.constant 0 : index
    %1 = vector.load %arg2[%c0_1, %c0_2] : memref<6x1xf32, #tpu.memory_space<vmem>>, vector<6x1xf32>
    %2 = vector.broadcast %1 : vector<6x1xf32> to vector<6x256xf32>
    %3 = arith.mulf %0, %2 : vector<6x256xf32>
    %c0_3 = arith.constant 0 : index
    %c0_4 = arith.constant 0 : index
    %4 = vector.load %arg3[%c0_3, %c0_4] : memref<6x1xf32, #tpu.memory_space<vmem>>, vector<6x1xf32>
    %5 = vector.broadcast %4 : vector<6x1xf32> to vector<6x256xf32>
    %6 = arith.addf %3, %5 : vector<6x256xf32>
    %c0_5 = arith.constant 0 : index
    %c0_6 = arith.constant 0 : index
    %7 = vector.load %arg5[%c0_5, %c0_6] : memref<6x256xf32, #tpu.memory_space<vmem>>, vector<6x256xf32>
    tpu.vector_store %arg5[%c0_5, %c0_6], %6 {strides = array<i32>} : memref<6x256xf32, #tpu.memory_space<vmem>>, vector<6x256xf32>,
    return
  }
  func.func @transform_0(%arg0: i32, %arg1: i32) -> (i32, i32) {
    %c0_i32 = arith.constant 0 : i32
    %c0_i32_0 = arith.constant 0 : i32
    return %arg0, %c0_i32 : i32, i32
  }
  func.func @transform_1(%arg0: i32, %arg1: i32) -> (i32, i32) {
    %c0_i32 = arith.constant 0 : i32
    %c0_i32_0 = arith.constant 0 : i32
    return %arg0, %c0_i32 : i32, i32
  }
  func.func @transform_2(%arg0: i32, %arg1: i32) -> (i32, i32) {
    %c0_i32 = arith.constant 0 : i32
    return %arg0, %arg1 : i32, i32
  }
  func.func @transform_3(%arg0: i32, %arg1: i32) -> (i32, i32) {
    %c0_i32 = arith.constant 0 : i32
    return %arg0, %arg1 : i32, i32
  }
}

</mosaic_0001>

<bundles_post_ra>
// kernel: tpu_custom_call.1
= control target key start
LH: loop header
LB: loop body
LE: loop exit
PB: predicated region body
PF: predicated region fallthrough
CT: control target
= control target key end

     0   :  { %v80_v1 = vmov 0   ;;  %s117_s0 = inlined_call_operand.vmem [shape: f32[6,1], index: 0, kind: input, shape index: {}]   ;;  %s118_s1 = inlined_call_operand.vmem [shape: f32[6,1], index: 1, kind: input, shape index: {}]   ;;  %s119_s2 = inlined_call_operand.vmem [shape: f32[6,256], index: 2, kind: input, shape index: {}]   ;;  %s120_s3 = inlined_call_operand.hbm [shape: f32[6,256], index: 3, kind: output, shape index: {}]  }
   0x1   :  { %v17_v0 = vld [vmem:[%s117_s0] sm:$0x3f]  ;;  %53 = vset.pattern.permute.xlu0 %v80_v1 }
   0x2   :  { %8 = vsyncpa [#allocation3], 0  ;;  %20 = vperm.xlu0 %53, %v17_v0   ;;  %v25_v2 = vld [vmem:[%s118_s1] sm:$0x3f]  ;;  %v16_v5 = vld [vmem:[%s119_s2 + $0x8] sm:$0x3f] }
   0x3   :  { %v15_v4 = vld [vmem:[%s119_s2] sm:$0x3f]  ;;  %s81_s0 = smov [#allocation2]   ;;  %s42_s23 = sshll.u32 %s120_s3, 4  ;;  %s43_s23 = int_to_ptr.hbm [resolvable:$true] %s42_s23 }
   0x4   :  { %s40_s20 = sshll.u32 %s81_s0, 4  ;;  %s41_s20 = int_to_ptr.vmem [resolvable:$true] %s40_s20 }
   0xa   :  { %28 = vperm.xlu0 %53, %v25_v2  }
  0x74   :  { %v21_v3 = vpop.permute.xlu0 %20 }
  0x75   :  { %v23_v6 = vmul.f32 %v21_v3, %v15_v4  ;;  %v24_v7 = vmul.f32 %v21_v3, %v16_v5 }
  0x7c   :  { %v29_v8 = vpop.permute.xlu0 %28 }
  0x7d   :  { %v31_v9 = vadd.f32 %v29_v8, %v23_v6  ;;  %v32_v10 = vadd.f32 %v29_v8, %v24_v7 }
  0x7f   :  { %33 = vst [vmem:[#allocation2] sm:$0x3f] %v31_v9 }
  0x80   :  { %34 = vst [vmem:[#allocation2 + $0x8] sm:$0x3f] %v32_v10 }
  0x81   :  { %45 = dma.vmem_to_hbm [thread:$0]  %s41_s20, 256, %s43_s23, [#allocation3]  }
  0x82   :  { %78 = dma.done.wait [#allocation3], 256  }
  0x83   :  { %79 = vsyncadd [#allocation3], 4294967040 }
  0x84   :  { %50 = vsyncpa [#allocation3], 1 }

</bundles_post_ra>
